<compile_context>
chip_gen: v6e
topology: v6e:2x2x1
jax: 0.10.0
libtpu: 0.0.40
codegen_flags: <defaults>
</compile_context>

<pallas_src>
import math

import jax
import jax.numpy as jnp
from jax.experimental import pallas as pl
from jax.experimental.pallas import tpu as pltpu


def _round_up(a, b):
    return (a + b - 1) // b * b


def _pick_tile(total, max_tile, multiple):
    """Largest multiple of `multiple` that divides `total` and is <= max_tile."""
    t = min(max_tile, total)
    t = max((t // multiple) * multiple, multiple)
    while total % t:
        t -= multiple
    return t


def _pad_cast(a, shape, dtype):
    """Cast to `dtype` and zero-pad to `shape`; skips copies when possible."""
    a = a.astype(dtype)
    if a.shape == tuple(shape):
        return a
    out = jnp.zeros(shape, dtype)
    return out.at[tuple(slice(0, s) for s in a.shape)].set(a)


def _vmem_limit_bytes():
    """Per-generation VMEM budget: ~3/4 of physical, capped at 100 MiB."""
    try:
        cap = pltpu.get_tpu_info().vmem_capacity_bytes
        return int(min(cap * 3 // 4, 100 * 1024 * 1024))
    except Exception:
        return 32 * 1024 * 1024


def _buffered_spec(block_shape, index_map, buffers):
    """BlockSpec with deeper pipelining; falls back if pipeline_mode is absent."""
    try:
        return pl.BlockSpec(block_shape, index_map,
                            pipeline_mode=pl.Buffered(buffers))
    except Exception:
        return pl.BlockSpec(block_shape, index_map)


# --------------------------------------------------------------------------
# Stage 1: support = x @ weight  (computed exactly once; weight VMEM-resident)
# --------------------------------------------------------------------------
def _support_kernel(x_ref, w_ref, o_ref):
    o_ref[...] = jnp.dot(
        x_ref[...], w_ref[...], preferred_element_type=jnp.float32
    ).astype(o_ref.dtype)


# --------------------------------------------------------------------------
# Stage 2: output = adj @ support (+ bias), tiled reduction over k.
# --------------------------------------------------------------------------
def _make_adj_kernel(has_bias, use_scratch, support_resident, tk):
    def kernel(*refs):
        adj_ref, s_ref = refs[0], refs[1]
        idx = 2
        b_ref = None
        if has_bias:
            b_ref = refs[idx]
            idx += 1
        o_ref = refs[idx]
        idx += 1
        # f32 outputs accumulate directly into the resident output block;
        # narrow output dtypes use an f32 VMEM scratch instead.
        acc_ref = refs[idx] if use_scratch else o_ref

        k = pl.program_id(1)

        @pl.when(k == 0)
        def _():
            acc_ref[...] = jnp.zeros_like(acc_ref)

        if support_resident:
            # support lives wholly in VMEM (DMA'd once); slice this k-block.
            off = pl.multiple_of(k * tk, tk)
            s = s_ref[pl.ds(off, tk), :]
        else:
            s = s_ref[...]

        # adj_ik @ support_k on the MXU with an f32 accumulator.
        acc_ref[...] += jnp.dot(adj_ref[...], s,
                                preferred_element_type=jnp.float32)

        if has_bias or use_scratch:
            @pl.when(k == pl.num_programs(1) - 1)
            def _():
                out = acc_ref[...]
                if has_bias:           # bias added exactly once, at finalize
                    out = out + b_ref[...].astype(jnp.float32)
                o_ref[...] = out.astype(o_ref.dtype)

    return kernel


def graph_convolution(x, adj, weight, bias=None, *,
                      block_rows=512, block_k=1024, lane=128,
                      compute_dtype=jnp.bfloat16,
                      support_resident_bytes=4 * 1024 * 1024,
                      adj_buffers=3):
    """GCN layer forward: adj @ (x @ weight) (+ bias).

    x: (N, F_in), adj: (N, N) dense, weight: (F_in, F_out), bias: (F_out,)|None.
    compute_dtype: matmul-input dtype (bf16 default = native MXU path and half
                   the adj HBM traffic); accumulation stays f32, the returned
                   output keeps x.dtype.  Pass jnp.float32 for exact numerics.
    """
    n, f_in = x.shape
    f_out = weight.shape[1]
    out_dtype = x.dtype
    if compute_dtype is None:
        compute_dtype = x.dtype
    compute_dtype = jnp.dtype(compute_dtype)
    itemsize = compute_dtype.itemsize

    # Lane-dense feature padding (full-width vst stores, filled MXU K/N dims).
    f_in_p = _round_up(f_in, lane)
    f_out_p = _round_up(f_out, lane)

    # Node padding: multiple of 128 only (no lcm blow-up); tiles divide n_pad.
    n_pad = _round_up(n, lane)
    tm = _pick_tile(n_pad, block_rows, lane)   # output / adj row tile
    tk = _pick_tile(n_pad, block_k, lane)      # reduction (adj column) tile

    # Zero-padding is exact: padded x/weight rows/cols are zero so padded
    # support entries are zero, and padded adj rows/cols contribute nothing to
    # the un-sliced output region.  Copies are skipped when already aligned.
    x_p = _pad_cast(x, (n_pad, f_in_p), compute_dtype)
    adj_p = _pad_cast(adj, (n_pad, n_pad), compute_dtype)
    w_p = _pad_cast(weight, (f_in_p, f_out_p), compute_dtype)

    vmem_limit = _vmem_limit_bytes()

    # ---------------- Stage 1: support = x @ weight -------------------------
    support = pl.pallas_call(
        _support_kernel,
        out_shape=jax.ShapeDtypeStruct((n_pad, f_out_p), compute_dtype),
        grid_spec=pltpu.PrefetchScalarGridSpec(
            num_scalar_prefetch=0,
            grid=(n_pad // tm,),
            in_specs=[
                pl.BlockSpec((tm, f_in_p), lambda i: (i, 0)),        # x rows
                pl.BlockSpec((f_in_p, f_out_p), lambda i: (0, 0)),   # weight
            ],
            out_specs=pl.BlockSpec((tm, f_out_p), lambda i: (i, 0)),
        ),
        compiler_params=pltpu.CompilerParams(
            dimension_semantics=("parallel",),
            vmem_limit_bytes=vmem_limit,
        ),
        cost_estimate=pl.CostEstimate(
            flops=2 * n_pad * f_in_p * f_out_p,
            transcendentals=0,
            bytes_accessed=(x_p.size + w_p.size + n_pad * f_out_p) * itemsize,
        ),
    )(x_p, w_p)

    # ---------------- Stage 2: output = adj @ support (+ bias) --------------
    support_resident = n_pad * f_out_p * itemsize <= support_resident_bytes
    has_bias = bias is not None
    use_scratch = jnp.dtype(out_dtype) != jnp.dtype(jnp.float32)

    in_specs = [
        # Heavy stream: deepen pipelining to hide HBM latency jitter.
        _buffered_spec((tm, tk), lambda i, k: (i, k), adj_buffers),
    ]
    operands = [adj_p, support]
    if support_resident:
        in_specs.append(pl.BlockSpec((n_pad, f_out_p), lambda i, k: (0, 0)))
    else:
        in_specs.append(
            _buffered_spec((tk, f_out_p), lambda i, k: (k, 0), adj_buffers))

    if has_bias:
        b_p = _pad_cast(bias.reshape(1, -1), (1, f_out_p), jnp.float32)
        in_specs.append(pl.BlockSpec((1, f_out_p), lambda i, k: (0, 0)))
        operands.append(b_p)

    scratch_shapes = (
        [pltpu.VMEM((tm, f_out_p), jnp.float32)] if use_scratch else []
    )

    support_reads = 1 if support_resident else n_pad // tm
    cost = pl.CostEstimate(
        flops=2 * n_pad * n_pad * f_out_p,
        transcendentals=0,
        bytes_accessed=(
            adj_p.size * itemsize
            + support_reads * n_pad * f_out_p * itemsize
            + (f_out_p * 4 if has_bias else 0)
            + n_pad * f_out_p * jnp.dtype(out_dtype).itemsize
        ),
    )

    kernel = _make_adj_kernel(has_bias, use_scratch, support_resident, tk)

    out_p = pl.pallas_call(
        kernel,
        out_shape=jax.ShapeDtypeStruct((n_pad, f_out_p), out_dtype),
        grid_spec=pltpu.PrefetchScalarGridSpec(
            num_scalar_prefetch=0,
            grid=(n_pad // tm, n_pad // tk),
            in_specs=in_specs,
            out_specs=pl.BlockSpec((tm, f_out_p), lambda i, k: (i, 0)),
            scratch_shapes=scratch_shapes,
        ),
        compiler_params=pltpu.CompilerParams(
            dimension_semantics=("parallel", "arbitrary"),
            vmem_limit_bytes=vmem_limit,
        ),
        cost_estimate=cost,
    )(*operands)

    return out_p[:n, :f_out]


if __name__ == "__main__":
    # Small, shape-consistent synthetic problem.
    N = 64          # number of graph nodes
    F_IN = 32       # in_features
    F_OUT = 16      # out_features

    key = jax.random.PRNGKey(0)
    k_x, k_adj, k_w, k_b = jax.random.split(key, 4)

    # Node features.
    x = jax.random.normal(k_x, (N, F_IN), dtype=jnp.float32)

    # Symmetric row-normalized adjacency (dense stand-in for the sparse adj).
    a = (jax.random.uniform(k_adj, (N, N)) < 0.1).astype(jnp.float32)
    a = jnp.maximum(a, a.T) + jnp.eye(N, dtype=jnp.float32)
    adj = a / jnp.sum(a, axis=1, keepdims=True)

    # Parameter init identical in distribution to reset_parameter():
    # uniform(-stdv, stdv) with stdv = 1 / sqrt(out_features).
    stdv = 1.0 / math.sqrt(F_OUT)
    weight = jax.random.uniform(k_w, (F_IN, F_OUT), minval=-stdv, maxval=stdv,
                                dtype=jnp.float32)
    bias = jax.random.uniform(k_b, (F_OUT,), minval=-stdv, maxval=stdv,
                              dtype=jnp.float32)

    ref = adj @ (x @ weight) + bias[None, :]
    ref_nb = adj @ (x @ weight)

    # Exact-numerics path (f32 compute), bias and no-bias.
    out_f32 = jax.block_until_ready(
        graph_convolution(x, adj, weight, bias, compute_dtype=jnp.float32))
    assert out_f32.shape == (N, F_OUT)
    assert jnp.allclose(out_f32, ref, atol=1e-4, rtol=1e-4)

    out_f32_nb = jax.block_until_ready(
        graph_convolution(x, adj, weight, None, compute_dtype=jnp.float32))
    assert jnp.allclose(out_f32_nb, ref_nb, atol=1e-4, rtol=1e-4)

    # Default bf16 compute (f32 accumulation) -- looser tolerance vs f32 ref.
    out_bf16 = jax.block_until_ready(graph_convolution(x, adj, weight, bias))
    assert out_bf16.shape == (N, F_OUT)
    assert out_bf16.dtype == jnp.float32
    assert jnp.allclose(out_bf16, ref, atol=5e-2, rtol=5e-2)

    # Unaligned shapes exercise the pad / tile-selection paths.
    N2, F_IN2, F_OUT2 = 100, 40, 7
    k2 = jax.random.split(jax.random.PRNGKey(1), 3)
    x2 = jax.random.normal(k2[0], (N2, F_IN2), dtype=jnp.float32)
    a2 = (jax.random.uniform(k2[1], (N2, N2)) < 0.1).astype(jnp.float32)
    a2 = jnp.maximum(a2, a2.T) + jnp.eye(N2, dtype=jnp.float32)
    adj2 = a2 / jnp.sum(a2, axis=1, keepdims=True)
    w2 = jax.random.uniform(k2[2], (F_IN2, F_OUT2), minval=-stdv, maxval=stdv,
                            dtype=jnp.float32)
    out2 = jax.block_until_ready(graph_convolution(x2, adj2, w2, None))
    ref2 = adj2 @ (x2 @ w2)
    assert out2.shape == (N2, F_OUT2)
    assert jnp.allclose(out2, ref2, atol=5e-2, rtol=5e-2)

    print("KERNEL_OK")
</pallas_src>

<mosaic_0001>
module attributes {stable_mosaic.version = 11 : i64} {
  func.func @_support_kernel(%arg0: i32, %arg1: memref<128x128xf32, #tpu.memory_space<vmem>>, %arg2: memref<128x128xf32, #tpu.memory_space<vmem>>, %arg3: memref<128x128xf32, #tpu.memory_space<vmem>>) attributes {dimension_semantics = [#tpu.dimension_semantics<parallel>], iteration_bounds = array<i64: 1>, scalar_prefetch = 0 : i64, scratch_operands = 0 : i64, tpu.core_type = #tpu.core_type<tc>, window_params = [{transform_indices = @transform_0, window_bounds = array<i64: 128, 128>}, {pipeline_mode = #tpu.pipeline_mode<synchronous>, transform_indices = @transform_1, window_bounds = array<i64: 128, 128>}, {transform_indices = @transform_2, window_bounds = array<i64: 128, 128>}]} {
    %c0 = arith.constant 0 : index
    %c0_0 = arith.constant 0 : index
    %0 = vector.load %arg1[%c0, %c0_0] : memref<128x128xf32, #tpu.memory_space<vmem>>, vector<128x128xf32>
    %c0_1 = arith.constant 0 : index
    %c0_2 = arith.constant 0 : index
    %1 = vector.load %arg2[%c0_1, %c0_2] : memref<128x128xf32, #tpu.memory_space<vmem>>, vector<128x128xf32>
    %cst = arith.constant dense<0.000000e+00> : vector<128x128xf32>
    %2 = tpu.matmul %0, %1, %cst {dimension_numbers = #tpu.dot_dimension_numbers<[1], [0], [0], [1], [0, 0, 1, 1], [], []>} : vector<128x128xf32>, vector<128x128xf32>, vector<128x128xf32> -> vector<128x128xf32>
    %c0_3 = arith.constant 0 : index
    %c0_4 = arith.constant 0 : index
    %3 = vector.load %arg3[%c0_3, %c0_4] : memref<128x128xf32, #tpu.memory_space<vmem>>, vector<128x128xf32>
    tpu.vector_store %arg3[%c0_3, %c0_4], %2 {strides = array<i32>} : memref<128x128xf32, #tpu.memory_space<vmem>>, vector<128x128xf32>,
    return
  }
  func.func @transform_0(%arg0: i32) -> (i32, i32) {
    %c0_i32 = arith.constant 0 : i32
    %c0_i32_0 = arith.constant 0 : i32
    return %arg0, %c0_i32 : i32, i32
  }
  func.func @transform_1(%arg0: i32) -> (i32, i32) {
    %c0_i32 = arith.constant 0 : i32
    %c0_i32_0 = arith.constant 0 : i32
    %c0_i32_1 = arith.constant 0 : i32
    return %c0_i32, %c0_i32_0 : i32, i32
  }
  func.func @transform_2(%arg0: i32) -> (i32, i32) {
    %c0_i32 = arith.constant 0 : i32
    %c0_i32_0 = arith.constant 0 : i32
    return %arg0, %c0_i32 : i32, i32
  }
}

</mosaic_0001>

<bundles_post_ra>
// kernel: tpu_custom_call.1
= control target key start
LH: loop header
LB: loop body
LE: loop exit
PB: predicated region body
PF: predicated region fallthrough
CT: control target
= control target key end

     0   :  { %7 = vsyncpa [#allocation3], 0  ;;  %s480_s0 = inlined_call_operand.hbm [shape: f32[128,128], index: 0, kind: input, shape index: {}]   ;;  %s481_s1 = inlined_call_operand.hbm [shape: f32[128,128], index: 1, kind: input, shape index: {}]   ;;  %s482_s2 = inlined_call_operand.hbm [shape: f32[128,128], index: 2, kind: output, shape index: {}]  }
   0x1   :  { %8 = vsyncpa [#allocation6], 0 }
   0x2   :  { %9 = vsyncpa [#allocation4], 0  ;;  %s442_s9 = smov [#allocation2]  }
   0x3   :  { %s15_s10 = sshll.u32 %s442_s9, 4  ;;  %s16_s10 = int_to_ptr.vmem [resolvable:$true] %s15_s10 }
   0x4   :  { %s384_s11 = scalar_lea.vmem %s16_s10, 2048  ;;  %p389_p1 = scmp.lt.s32.totalorder %s16_s10, %s16_s10 }
   0x5   :  { %p385_p0 = scmp.ne.s32.totalorder %s16_s10, %s384_s11  ;;  %p390_p2 = scmp.lt.s32.totalorder %s384_s11, %s384_s11 }
   0x7   :  { %p391_p3 = por %p390_p2, %p389_p1 }
   0x9   :  { %p392_p4 = pnand %p391_p3, %p385_p0 }
   0xb   :  { %395 = shalt.err (!%p392_p4)
}
   0xc   :  { %s443_s12 = smov 128   ;;  %s444_s13 = smov 8  }
   0xd   :  { %21 = dma.hbm_to_vmem [thread:$0]  %s480_s0, 2048, %s16_s10, [#allocation3], %s443_s12, %s443_s12, %s444_s13  }
   0xe   :  { %s445_s16 = smov [#allocation5]  }
   0xf   :  { %s27_s17 = sshll.u32 %s445_s16, 4  ;;  %s28_s17 = int_to_ptr.vmem [resolvable:$true] %s27_s17 }
  0x10   :  { %s404_s18 = scalar_lea.vmem %s28_s17, 2048  ;;  %p409_p6 = scmp.lt.s32.totalorder %s28_s17, %s28_s17 }
  0x11   :  { %p405_p5 = scmp.ne.s32.totalorder %s28_s17, %s404_s18  ;;  %p410_p7 = scmp.lt.s32.totalorder %s404_s18, %s404_s18 }
  0x13   :  { %p411_p8 = por %p410_p7, %p409_p6 }
  0x15   :  { %p412_p9 = pnand %p411_p8, %p405_p5 }
  0x17   :  { %415 = shalt.err (!%p412_p9)
}
  0x18   :  { %33 = dma.hbm_to_vmem [thread:$0]  %s481_s1, 2048, %s28_s17, [#allocation6], %s443_s12, %s443_s12, %s444_s13  }
  0x19   :  { %436 = dma.done.wait [#allocation3], 2048  }
  0x1a   :  { %437 = vsyncadd [#allocation3], 4294965248 }
  0x1b   :  { %438 = dma.done.wait [#allocation6], 2048  }
  0x1c   :  { %439 = vsyncadd [#allocation6], 4294965248  ;;  %v71_v0 = vld [vmem:[#allocation5 + $0x78] sm:$0xff]  ;;  %v70_v1 = vld [vmem:[#allocation5 + $0x70] sm:$0xff]  ;;  %s446_s0 = smov [#allocation7]  }
  0x1d   :  { %283 = vmatprep.subr.mxu0 %v71_v0  ;;  %339 = vmatprep.subr.mxu1 %v71_v0  ;;  %v69_v2 = vld [vmem:[#allocation5 + $0x68] sm:$0xff]  ;;  %v68_v3 = vld [vmem:[#allocation5 + $0x60] sm:$0xff]  ;;  %v67_v4 = vld [vmem:[#allocation5 + $0x58] sm:$0xff]  ;;  %s238_s1 = sshll.u32 %s446_s0, 4  ;;  %s239_s1 = int_to_ptr.vmem [resolvable:$true] %s238_s1 }
  0x1e   :  { %284 = vmatpush3.msra.mxu0 %v71_v0  ;;  %355 = vmatpush3.msra.mxu1 %v71_v0  ;;  %v66_v5 = vld [vmem:[#allocation5 + $0x50] sm:$0xff]  ;;  %v65_v6 = vld [vmem:[#allocation5 + $0x48] sm:$0xff]  ;;  %v64_v7 = vld [vmem:[#allocation5 + $0x40] sm:$0xff]  ;;  %s416_s21 = scalar_lea.vmem %s239_s1, 2048  ;;  %p421_p11 = scmp.lt.s32.totalorder %s239_s1, %s239_s1 }
  0x1f   :  { %285 = vmatprep.subr.mxu0 %v70_v1  ;;  %340 = vmatprep.subr.mxu1 %v70_v1  ;;  %v63_v8 = vld [vmem:[#allocation5 + $0x38] sm:$0xff]  ;;  %v62_v9 = vld [vmem:[#allocation5 + $0x30] sm:$0xff]  ;;  %v61_v10 = vld [vmem:[#allocation5 + $0x28] sm:$0xff]  ;;  %p417_p10 = scmp.ne.s32.totalorder %s239_s1, %s416_s21  ;;  %p422_p12 = scmp.lt.s32.totalorder %s416_s21, %s416_s21 }
  0x20   :  { %286 = vmatpush3.msra.mxu0 %v70_v1  ;;  %356 = vmatpush3.msra.mxu1 %v70_v1  ;;  %v60_v11 = vld [vmem:[#allocation5 + $0x20] sm:$0xff]  ;;  %v59_v12 = vld [vmem:[#allocation5 + $0x18] sm:$0xff]  ;;  %v58_v13 = vld [vmem:[#allocation5 + $0x10] sm:$0xff] }
  0x21   :  { %287 = vmatprep.subr.mxu0 %v69_v2  ;;  %341 = vmatprep.subr.mxu1 %v69_v2  ;;  %v57_v14 = vld [vmem:[#allocation5 + $0x8] sm:$0xff]  ;;  %v56_v15 = vld [vmem:[#allocation5] sm:$0xff]  ;;  %v42_v20 = vld [vmem:[#allocation2 + $0x10] sm:$0xff]  ;;  %p423_p13 = por %p422_p12, %p421_p11 }
  0x22   :  { %288 = vmatpush3.msra.mxu0 %v69_v2  ;;  %357 = vmatpush3.msra.mxu1 %v69_v2  ;;  %v40_v16 = vld [vmem:[#allocation2] sm:$0xff]  ;;  %v41_v18 = vld [vmem:[#allocation2 + $0x8] sm:$0xff]  ;;  %v50_v21 = vld [vmem:[#allocation2 + $0x50] sm:$0xff] }
  0x23   :  { %289 = vmatprep.subr.mxu0 %v68_v3  ;;  %342 = vmatprep.subr.mxu1 %v68_v3  ;;  %v48_v17 = vld [vmem:[#allocation2 + $0x40] sm:$0xff]  ;;  %v49_v19 = vld [vmem:[#allocation2 + $0x48] sm:$0xff]  ;;  %v43_v22 = vld [vmem:[#allocation2 + $0x18] sm:$0xff]  ;;  %p424_p0 = pnand %p423_p13, %p417_p10 }
  0x24   :  { %290 = vmatpush3.msra.mxu0 %v68_v3  ;;  %358 = vmatpush3.msra.mxu1 %v68_v3  ;;  %v51_v23 = vld [vmem:[#allocation2 + $0x58] sm:$0xff]  ;;  %v44_v24 = vld [vmem:[#allocation2 + $0x20] sm:$0xff]  ;;  %v45_v26 = vld [vmem:[#allocation2 + $0x28] sm:$0xff] }
  0x25   :  { %291 = vmatprep.subr.mxu0 %v67_v4  ;;  %343 = vmatprep.subr.mxu1 %v67_v4  ;;  %v52_v25 = vld [vmem:[#allocation2 + $0x60] sm:$0xff]  ;;  %v53_v27 = vld [vmem:[#allocation2 + $0x68] sm:$0xff]  ;;  %v46_v28 = vld [vmem:[#allocation2 + $0x30] sm:$0xff] }
  0x26   :  { %292 = vmatpush3.msra.mxu0 %v67_v4  ;;  %359 = vmatpush3.msra.mxu1 %v67_v4  ;;  %v54_v29 = vld [vmem:[#allocation2 + $0x70] sm:$0xff]  ;;  %v47_v30 = vld [vmem:[#allocation2 + $0x38] sm:$0xff] }
  0x27   :  { %293 = vmatprep.subr.mxu0 %v66_v5  ;;  %344 = vmatprep.subr.mxu1 %v66_v5  ;;  %v55_v31 = vld [vmem:[#allocation2 + $0x78] sm:$0xff] }
  0x28   :  { %294 = vmatpush3.msra.mxu0 %v66_v5  ;;  %360 = vmatpush3.msra.mxu1 %v66_v5 }
  0x29   :  { %295 = vmatprep.subr.mxu0 %v65_v6  ;;  %345 = vmatprep.subr.mxu1 %v65_v6 }
  0x2a   :  { %296 = vmatpush3.msra.mxu0 %v65_v6  ;;  %361 = vmatpush3.msra.mxu1 %v65_v6 }
  0x2b   :  { %297 = vmatprep.subr.mxu0 %v64_v7  ;;  %346 = vmatprep.subr.mxu1 %v64_v7 }
  0x2c   :  { %298 = vmatpush3.msra.mxu0 %v64_v7  ;;  %362 = vmatpush3.msra.mxu1 %v64_v7 }
  0x2d   :  { %299 = vmatprep.subr.mxu0 %v63_v8  ;;  %347 = vmatprep.subr.mxu1 %v63_v8 }
  0x2e   :  { %300 = vmatpush3.msra.mxu0 %v63_v8  ;;  %363 = vmatpush3.msra.mxu1 %v63_v8 }
  0x2f   :  { %301 = vmatprep.subr.mxu0 %v62_v9  ;;  %348 = vmatprep.subr.mxu1 %v62_v9 }
  0x30   :  { %302 = vmatpush3.msra.mxu0 %v62_v9  ;;  %364 = vmatpush3.msra.mxu1 %v62_v9 }
  0x31   :  { %303 = vmatprep.subr.mxu0 %v61_v10  ;;  %349 = vmatprep.subr.mxu1 %v61_v10 }
  0x32   :  { %304 = vmatpush3.msra.mxu0 %v61_v10  ;;  %365 = vmatpush3.msra.mxu1 %v61_v10 }
  0x33   :  { %305 = vmatprep.subr.mxu0 %v60_v11  ;;  %350 = vmatprep.subr.mxu1 %v60_v11 }
  0x34   :  { %306 = vmatpush3.msra.mxu0 %v60_v11  ;;  %366 = vmatpush3.msra.mxu1 %v60_v11 }
  0x35   :  { %307 = vmatprep.subr.mxu0 %v59_v12  ;;  %351 = vmatprep.subr.mxu1 %v59_v12 }
  0x36   :  { %308 = vmatpush3.msra.mxu0 %v59_v12  ;;  %367 = vmatpush3.msra.mxu1 %v59_v12 }
  0x37   :  { %309 = vmatprep.subr.mxu0 %v58_v13  ;;  %352 = vmatprep.subr.mxu1 %v58_v13 }
  0x38   :  { %310 = vmatpush3.msra.mxu0 %v58_v13  ;;  %368 = vmatpush3.msra.mxu1 %v58_v13 }
  0x39   :  { %311 = vmatprep.subr.mxu0 %v57_v14  ;;  %353 = vmatprep.subr.mxu1 %v57_v14 }
  0x3a   :  { %312 = vmatpush3.msra.mxu0 %v57_v14  ;;  %369 = vmatpush3.msra.mxu1 %v57_v14 }
  0x3b   :  { %313 = vmatprep.subr.mxu0 %v56_v15  ;;  %354 = vmatprep.subr.mxu1 %v56_v15 }
  0x3c   :  { %314 = vmatpush3.msra.mxu0 %v56_v15  ;;  %370 = vmatpush3.msra.mxu1 %v56_v15 }
  0x3d   :  { %315 = vmatprep.mubr.f32.mxu0 %v40_v16  ;;  %327 = vmatprep.mubr.f32.mxu1 %v48_v17 }
  0x3e   :  { %316 = vmatmul.mubr.f32.vlgmr.msra.gmra.mxu0 %v41_v18  ;;  %328 = vmatmul.mubr.f32.vlgmr.msra.gmra.mxu1 %v49_v19 }
  0x3f   :  { %318 = vmatprep.mubr.f32.mxu0 %v42_v20  ;;  %330 = vmatprep.mubr.f32.mxu1 %v50_v21 }
  0x42   :  { %319 = vmatmul.mubr.f32.gmra.mxu0 %v43_v22  ;;  %331 = vmatmul.mubr.f32.gmra.mxu1 %v51_v23 }
  0x43   :  { %321 = vmatprep.mubr.f32.mxu0 %v44_v24  ;;  %333 = vmatprep.mubr.f32.mxu1 %v52_v25 }
  0x46   :  { %322 = vmatmul.mubr.f32.gmra.mxu0 %v45_v26  ;;  %334 = vmatmul.mubr.f32.gmra.mxu1 %v53_v27 }
  0x47   :  { %324 = vmatprep.mubr.f32.mxu0 %v46_v28  ;;  %336 = vmatprep.mubr.f32.mxu1 %v54_v29 }
  0x4a   :  { %325 = vmatmul.mubr.f32.gmra.mxu0 %v47_v30  ;;  %337 = vmatmul.mubr.f32.gmra.mxu1 %v55_v31 }
  0xfe   :  { %v317_v32 = vpop.f32.mrf.mxu0  ;;  %v329_v33 = vpop.f32.mrf.mxu1 }
  0xff   :  { %218 = vst [vmem:[#allocation7 + $0x8] sm:$0xff] %v317_v32  ;;  %226 = vst [vmem:[#allocation7 + $0x48] sm:$0xff] %v329_v33 }
 0x100   :  { %v138_v34 = vpop.f32.mrf.mxu0  ;;  %v178_v35 = vpop.f32.mrf.mxu1 }
 0x101   :  { %217 = vst [vmem:[#allocation7] sm:$0xff] %v138_v34  ;;  %225 = vst [vmem:[#allocation7 + $0x40] sm:$0xff] %v178_v35 }
 0x102   :  { %v320_v36 = vpop.f32.mrf.mxu0  ;;  %v332_v37 = vpop.f32.mrf.mxu1 }
 0x103   :  { %220 = vst [vmem:[#allocation7 + $0x18] sm:$0xff] %v320_v36  ;;  %228 = vst [vmem:[#allocation7 + $0x58] sm:$0xff] %v332_v37 }
 0x104   :  { %v148_v38 = vpop.f32.mrf.mxu0  ;;  %v188_v39 = vpop.f32.mrf.mxu1 }
 0x105   :  { %219 = vst [vmem:[#allocation7 + $0x10] sm:$0xff] %v148_v38  ;;  %227 = vst [vmem:[#allocation7 + $0x50] sm:$0xff] %v188_v39 }
 0x106   :  { %v323_v40 = vpop.f32.mrf.mxu0  ;;  %v335_v41 = vpop.f32.mrf.mxu1 }
 0x107   :  { %222 = vst [vmem:[#allocation7 + $0x28] sm:$0xff] %v323_v40  ;;  %230 = vst [vmem:[#allocation7 + $0x68] sm:$0xff] %v335_v41 }
 0x108   :  { %v158_v42 = vpop.f32.mrf.mxu0  ;;  %v198_v43 = vpop.f32.mrf.mxu1 }
 0x109   :  { %221 = vst [vmem:[#allocation7 + $0x20] sm:$0xff] %v158_v42  ;;  %229 = vst [vmem:[#allocation7 + $0x60] sm:$0xff] %v198_v43 }
 0x10a   :  { %v326_v44 = vpop.f32.mrf.mxu0  ;;  %v338_v45 = vpop.f32.mrf.mxu1 }
 0x10b   :  { %224 = vst [vmem:[#allocation7 + $0x38] sm:$0xff] %v326_v44  ;;  %232 = vst [vmem:[#allocation7 + $0x78] sm:$0xff] %v338_v45 }
 0x10c   :  { %v168_v46 = vpop.f32.mrf.mxu0  ;;  %v208_v47 = vpop.f32.mrf.mxu1 }
 0x10d   :  { %223 = vst [vmem:[#allocation7 + $0x30] sm:$0xff] %v168_v46  ;;  %231 = vst [vmem:[#allocation7 + $0x70] sm:$0xff] %v208_v47 }
 0x10e   :  { %427 = shalt.err (!%p424_p0)
}
 0x10f   :  { %244 = dma.vmem_to_hbm [thread:$0]  %s239_s1, 2048, %s482_s2, [#allocation4], %s443_s12, %s443_s12, %s444_s13  }
 0x110   :  { %440 = dma.done.wait [#allocation4], 2048  }
 0x111   :  { %441 = vsyncadd [#allocation4], 4294965248 }
 0x112   :  { %248 = vsyncpa [#allocation3], 1 }
 0x113   :  { %249 = vsyncpa [#allocation6], 1 }
 0x114   :  { %250 = vsyncpa [#allocation4], 1 }

</bundles_post_ra>
